<compile_context>
chip_gen: v5e
topology: v5e:2x2
jax: 0.10.0
libtpu: 0.0.40
codegen_flags: <defaults>
</compile_context>

<pallas_src>
import functools

import jax
import jax.numpy as jnp
from jax.experimental import pallas as pl
from jax.experimental.pallas import tpu as pltpu

LANE = 128


def _round_up(x, m):
    return (x + m - 1) // m * m


def _dice_kernel(p_ref, l_ref, out_ref, acc_pl_ref, acc_ps_ref, *, rows, block_rows):
    """Grid axis 0 walks row-tiles; VMEM (8,128) accumulators hold partial sums."""
    i = pl.program_id(0)
    nblk = pl.num_programs(0)

    @pl.when(i == 0)
    def _():
        acc_pl_ref[...] = jnp.zeros_like(acc_pl_ref)
        acc_ps_ref[...] = jnp.zeros_like(acc_ps_ref)

    x = p_ref[...].astype(jnp.float32)
    lbl = l_ref[...].astype(jnp.float32)
    # sigmoid(x) == 0.5 * (tanh(0.5 * x) + 1)  -> single EUP push per element.
    p = 0.5 * (jnp.tanh(0.5 * x) + 1.0)

    bg = block_rows // 8  # block_rows is always a multiple of 8

    def _accum(pv, lv):
        # Reshape keeps native (8,128) tiling -> axis-0 sum is pure VPU adds.
        acc_pl_ref[...] += jnp.sum((pv * lv).reshape(bg, 8, LANE), axis=0)
        acc_ps_ref[...] += jnp.sum((pv + lv).reshape(bg, 8, LANE), axis=0)

    if rows % block_rows != 0:
        # Last row-block is partial: rows >= `rows` contain garbage -> mask them.
        @pl.when(i != nblk - 1)
        def _():
            _accum(p, lbl)

        @pl.when(i == nblk - 1)
        def _():
            row_ids = jax.lax.broadcasted_iota(jnp.int32, (block_rows, LANE), 0)
            valid = (i * block_rows + row_ids) < rows
            _accum(jnp.where(valid, p, 0.0), jnp.where(valid, lbl, 0.0))
    else:
        _accum(p, lbl)

    @pl.when(i == nblk - 1)
    def _():
        # Single cross-lane/sublane reduction, once.
        out_ref[0, 0] = jnp.sum(acc_pl_ref[...])  # sum(p * l)
        out_ref[0, 1] = jnp.sum(acc_ps_ref[...])  # sum(p) + sum(l)


def dice_loss(preds, labels, smooth=1.0, block_rows=2048):
    """Pallas implementation of DiceLoss.forward (returns scalar f32)."""
    assert preds.shape == labels.shape
    n = preds.size

    p_flat = preds.reshape(-1)   # free for contiguous arrays
    l_flat = labels.reshape(-1)

    rows = n // LANE
    n_main = rows * LANE

    s_pl = jnp.float32(0.0)   # sum(sigmoid(p) * l)
    s_ps = jnp.float32(0.0)   # sum(sigmoid(p)) + sum(l)

    if rows > 0:
        if n_main == n:
            p2 = p_flat.reshape(rows, LANE)
            l2 = l_flat.reshape(rows, LANE)
        else:
            p2 = p_flat[:n_main].reshape(rows, LANE)
            l2 = l_flat[:n_main].reshape(rows, LANE)

        # Row-tile size: multiple of 8, no larger than needed, capped by block_rows.
        br = min(_round_up(int(block_rows), 8), _round_up(rows, 8))
        grid = (pl.cdiv(rows, br),)

        sums = pl.pallas_call(
            functools.partial(_dice_kernel, rows=rows, block_rows=br),
            out_shape=jax.ShapeDtypeStruct((1, 2), jnp.float32),
            grid_spec=pltpu.PrefetchScalarGridSpec(
                num_scalar_prefetch=0,
                grid=grid,
                in_specs=[
                    pl.BlockSpec((br, LANE), lambda i: (i, 0)),
                    pl.BlockSpec((br, LANE), lambda i: (i, 0)),
                ],
                out_specs=pl.BlockSpec(
                    (1, 2), lambda i: (0, 0), memory_space=pltpu.SMEM
                ),
                scratch_shapes=[
                    pltpu.VMEM((8, LANE), jnp.float32),
                    pltpu.VMEM((8, LANE), jnp.float32),
                ],
            ),
            compiler_params=pltpu.CompilerParams(
                # Single reduction axis; on v7x this could be split into
                # ("parallel", "arbitrary") with per-core partial-sum outputs.
                dimension_semantics=("arbitrary",)
            ),
        )(p2, l2)
        s_pl = s_pl + sums[0, 0]
        s_ps = s_ps + sums[0, 1]

    if n_main < n:
        # Sub-lane tail (< 128 elements): negligible, handled with plain jnp.
        pt = 0.5 * (jnp.tanh(0.5 * p_flat[n_main:].astype(jnp.float32)) + 1.0)
        lt = l_flat[n_main:].astype(jnp.float32)
        s_pl = s_pl + jnp.sum(pt * lt)
        s_ps = s_ps + jnp.sum(pt + lt)

    smooth = jnp.float32(smooth)
    dice = (2.0 * s_pl + smooth) / (s_ps + smooth)
    return jnp.float32(1.0) - dice


def _dice_loss_ref(preds, labels, smooth=1.0):
    p = jax.nn.sigmoid(preds.astype(jnp.float32)).reshape(-1)
    l = labels.astype(jnp.float32).reshape(-1)
    inters = 2.0 * jnp.sum(p * l)
    dice = (inters + smooth) / (jnp.sum(p) + jnp.sum(l) + smooth)
    return 1.0 - dice


if __name__ == "__main__":
    key = jax.random.PRNGKey(0)
    k1, k2 = jax.random.split(key)

    # NCHW logits and binary labels, small shapes.
    preds = jax.random.normal(k1, (2, 4, 16, 16), dtype=jnp.float32)
    labels = (jax.random.uniform(k2, (2, 4, 16, 16)) > 0.5).astype(jnp.float32)

    loss = dice_loss(preds, labels, smooth=1.0)
    loss = jax.block_until_ready(loss)

    ref = _dice_loss_ref(preds, labels, smooth=1.0)
    assert jnp.allclose(loss, ref, rtol=1e-5, atol=1e-5), (loss, ref)

    print("KERNEL_OK")
</pallas_src>

<mosaic_0001>
module attributes {stable_mosaic.version = 11 : i64} {
  func.func @_dice_kernel(%arg0: i32, %arg1: memref<16x128xf32, #tpu.memory_space<vmem>>, %arg2: memref<16x128xf32, #tpu.memory_space<vmem>>, %arg3: memref<1x2xf32, #tpu.memory_space<smem>>, %arg4: memref<8x128xf32, #tpu.memory_space<vmem>>, %arg5: memref<8x128xf32, #tpu.memory_space<vmem>>) attributes {dimension_semantics = [#tpu.dimension_semantics<arbitrary>], iteration_bounds = array<i64: 1>, scalar_prefetch = 0 : i64, scratch_operands = 2 : i64, tpu.core_type = #tpu.core_type<tc>, window_params = [{transform_indices = @transform_0, window_bounds = array<i64: 16, 128>}, {transform_indices = @transform_1, window_bounds = array<i64: 16, 128>}, {transform_indices = @transform_2, window_bounds = array<i64: 1, 2>}]} {
    %c0_i32 = arith.constant 0 : i32
    %0 = arith.cmpi eq, %arg0, %c0_i32 : i32
    %1 = arith.extui %0 : i1 to i32
    %c0_i32_0 = arith.constant 0 : i32
    %2 = arith.cmpi ne, %1, %c0_i32_0 : i32
    scf.if %2 {
      %cst_18 = arith.constant 0.000000e+00 : f32
      %27 = vector.broadcast %cst_18 : f32 to vector<8x128xf32>
      %c0_19 = arith.constant 0 : index
      %c0_20 = arith.constant 0 : index
      %28 = vector.load %arg4[%c0_19, %c0_20] : memref<8x128xf32, #tpu.memory_space<vmem>>, vector<8x128xf32>
      tpu.vector_store %arg4[%c0_19, %c0_20], %27 {strides = array<i32>} : memref<8x128xf32, #tpu.memory_space<vmem>>, vector<8x128xf32>,
      %cst_21 = arith.constant 0.000000e+00 : f32
      %29 = vector.broadcast %cst_21 : f32 to vector<8x128xf32>
      %c0_22 = arith.constant 0 : index
      %c0_23 = arith.constant 0 : index
      %30 = vector.load %arg5[%c0_22, %c0_23] : memref<8x128xf32, #tpu.memory_space<vmem>>, vector<8x128xf32>
      tpu.vector_store %arg5[%c0_22, %c0_23], %29 {strides = array<i32>} : memref<8x128xf32, #tpu.memory_space<vmem>>, vector<8x128xf32>,
    } else {
    }
    %c0 = arith.constant 0 : index
    %c0_1 = arith.constant 0 : index
    %3 = vector.load %arg1[%c0, %c0_1] : memref<16x128xf32, #tpu.memory_space<vmem>>, vector<16x128xf32>
    %c0_2 = arith.constant 0 : index
    %c0_3 = arith.constant 0 : index
    %4 = vector.load %arg2[%c0_2, %c0_3] : memref<16x128xf32, #tpu.memory_space<vmem>>, vector<16x128xf32>
    %cst = arith.constant 5.000000e-01 : f32
    %5 = vector.broadcast %cst : f32 to vector<16x128xf32>
    %6 = arith.mulf %5, %3 : vector<16x128xf32>
    %7 = math.tanh %6 : vector<16x128xf32>
    %cst_4 = arith.constant 1.000000e+00 : f32
    %8 = vector.broadcast %cst_4 : f32 to vector<16x128xf32>
    %9 = arith.addf %7, %8 : vector<16x128xf32>
    %cst_5 = arith.constant 5.000000e-01 : f32
    %10 = vector.broadcast %cst_5 : f32 to vector<16x128xf32>
    %11 = arith.mulf %10, %9 : vector<16x128xf32>
    %c0_6 = arith.constant 0 : index
    %c0_7 = arith.constant 0 : index
    %12 = vector.load %arg4[%c0_6, %c0_7] : memref<8x128xf32, #tpu.memory_space<vmem>>, vector<8x128xf32>
    %13 = arith.mulf %11, %4 : vector<16x128xf32>
    %14 = vector.shape_cast %13 : vector<16x128xf32> to vector<2x8x128xf32>
    %cst_8 = arith.constant dense<0.000000e+00> : vector<8x128xf32>
    %15 = vector.multi_reduction <add>, %14, %cst_8 [0] : vector<2x8x128xf32> to vector<8x128xf32>
    %16 = arith.addf %12, %15 : vector<8x128xf32>
    %c0_9 = arith.constant 0 : index
    %c0_10 = arith.constant 0 : index
    %17 = vector.load %arg4[%c0_9, %c0_10] : memref<8x128xf32, #tpu.memory_space<vmem>>, vector<8x128xf32>
    tpu.vector_store %arg4[%c0_9, %c0_10], %16 {strides = array<i32>} : memref<8x128xf32, #tpu.memory_space<vmem>>, vector<8x128xf32>,
    %c0_11 = arith.constant 0 : index
    %c0_12 = arith.constant 0 : index
    %18 = vector.load %arg5[%c0_11, %c0_12] : memref<8x128xf32, #tpu.memory_space<vmem>>, vector<8x128xf32>
    %19 = arith.addf %11, %4 : vector<16x128xf32>
    %20 = vector.shape_cast %19 : vector<16x128xf32> to vector<2x8x128xf32>
    %cst_13 = arith.constant dense<0.000000e+00> : vector<8x128xf32>
    %21 = vector.multi_reduction <add>, %20, %cst_13 [0] : vector<2x8x128xf32> to vector<8x128xf32>
    %22 = arith.addf %18, %21 : vector<8x128xf32>
    %c0_14 = arith.constant 0 : index
    %c0_15 = arith.constant 0 : index
    %23 = vector.load %arg5[%c0_14, %c0_15] : memref<8x128xf32, #tpu.memory_space<vmem>>, vector<8x128xf32>
    tpu.vector_store %arg5[%c0_14, %c0_15], %22 {strides = array<i32>} : memref<8x128xf32, #tpu.memory_space<vmem>>, vector<8x128xf32>,
    %c0_i32_16 = arith.constant 0 : i32
    %24 = arith.cmpi eq, %arg0, %c0_i32_16 : i32
    %25 = arith.extui %24 : i1 to i32
    %c0_i32_17 = arith.constant 0 : i32
    %26 = arith.cmpi ne, %25, %c0_i32_17 : i32
    scf.if %26 {
      %c0_18 = arith.constant 0 : index
      %c0_19 = arith.constant 0 : index
      %27 = vector.load %arg4[%c0_18, %c0_19] : memref<8x128xf32, #tpu.memory_space<vmem>>, vector<8x128xf32>
      %28 = vector.shape_cast %27 : vector<8x128xf32> to vector<1x8x128xf32>
      %cst_20 = arith.constant dense<0.000000e+00> : vector<1xf32>
      %29 = vector.multi_reduction <add>, %28, %cst_20 [1, 2] : vector<1x8x128xf32> to vector<1xf32>
      %30 = vector.shape_cast %29 : vector<1xf32> to vector<1x1x1xf32>
      %31 = vector.extract %30[0, 0, 0] : f32 from vector<1x1x1xf32>
      %c0_21 = arith.constant 0 : index
      %c0_22 = arith.constant 0 : index
      %32 = memref.load %arg3[%c0_21, %c0_22] : memref<1x2xf32, #tpu.memory_space<smem>>
      memref.store %31, %arg3[%c0_21, %c0_22] : memref<1x2xf32, #tpu.memory_space<smem>>
      %c0_23 = arith.constant 0 : index
      %c0_24 = arith.constant 0 : index
      %33 = vector.load %arg5[%c0_23, %c0_24] : memref<8x128xf32, #tpu.memory_space<vmem>>, vector<8x128xf32>
      %34 = vector.shape_cast %33 : vector<8x128xf32> to vector<1x8x128xf32>
      %cst_25 = arith.constant dense<0.000000e+00> : vector<1xf32>
      %35 = vector.multi_reduction <add>, %34, %cst_25 [1, 2] : vector<1x8x128xf32> to vector<1xf32>
      %36 = vector.shape_cast %35 : vector<1xf32> to vector<1x1x1xf32>
      %37 = vector.extract %36[0, 0, 0] : f32 from vector<1x1x1xf32>
      %c0_26 = arith.constant 0 : index
      %c1 = arith.constant 1 : index
      %38 = memref.load %arg3[%c0_26, %c1] : memref<1x2xf32, #tpu.memory_space<smem>>
      memref.store %37, %arg3[%c0_26, %c1] : memref<1x2xf32, #tpu.memory_space<smem>>
    } else {
    }
    return
  }
  func.func @transform_0(%arg0: i32) -> (i32, i32) {
    %c0_i32 = arith.constant 0 : i32
    %c0_i32_0 = arith.constant 0 : i32
    return %arg0, %c0_i32 : i32, i32
  }
  func.func @transform_1(%arg0: i32) -> (i32, i32) {
    %c0_i32 = arith.constant 0 : i32
    %c0_i32_0 = arith.constant 0 : i32
    return %arg0, %c0_i32 : i32, i32
  }
  func.func @transform_2(%arg0: i32) -> (i32, i32) {
    %c0_i32 = arith.constant 0 : i32
    %c0_i32_0 = arith.constant 0 : i32
    %c0_i32_1 = arith.constant 0 : i32
    return %c0_i32, %c0_i32_0 : i32, i32
  }
}

</mosaic_0001>

<bundles_post_ra>
// kernel: tpu_custom_call.1
= control target key start
LH: loop header
LB: loop body
LE: loop exit
PB: predicated region body
PF: predicated region fallthrough
CT: control target
= control target key end

     0   :  { %7 = vsyncpa [#allocation5], 0  ;;  %s226_s0 = inlined_call_operand.hbm [shape: f32[16,128], index: 0, kind: input, shape index: {}]   ;;  %s227_s1 = inlined_call_operand.hbm [shape: f32[16,128], index: 1, kind: input, shape index: {}]   ;;  %s228_s2 = inlined_call_operand.hbm [shape: f32[1,2], index: 2, kind: output, shape index: {}]  }
   0x1   :  { %8 = vsyncpa [#allocation8], 0 }
   0x2   :  { %9 = vsyncpa [#allocation6], 0  ;;  %s14_s11 = sshll.u32 %s226_s0, 4  ;;  %s197_s12 = smov [#allocation4]   ;;  %s15_s11 = int_to_ptr.hbm [resolvable:$true] %s14_s11 }
   0x3   :  { %s16_s13 = sshll.u32 %s197_s12, 4  ;;  %s27_s16 = sshll.u32 %s227_s1, 4  ;;  %s17_s13 = int_to_ptr.vmem [resolvable:$true] %s16_s13  ;;  %s28_s16 = int_to_ptr.hbm [resolvable:$true] %s27_s16 }
   0x4   :  { %s198_s17 = smov 128   ;;  %s199_s18 = smov 8  }
   0x5   :  { %22 = dma.hbm_to_vmem [thread:$0]  %s15_s11, 256, %s17_s13, [#allocation5], %s198_s17, %s198_s17, %s199_s18  }
   0x6   :  { %s200_s19 = smov [#allocation7]  }
   0x7   :  { %s29_s20 = sshll.u32 %s200_s19, 4  ;;  %s30_s20 = int_to_ptr.vmem [resolvable:$true] %s29_s20 }
   0x8   :  { %35 = dma.hbm_to_vmem [thread:$0]  %s28_s16, 256, %s30_s20, [#allocation8], %s198_s17, %s198_s17, %s199_s18  }
   0x9   :  { %191 = dma.done.wait [#allocation5], 256  }
   0xa   :  { %192 = vsyncadd [#allocation5], 4294967040 }
   0xb   :  { %193 = dma.done.wait [#allocation8], 256  }
   0xc   :  { %194 = vsyncadd [#allocation8], 4294967040  ;;  %v50_v0 = vld [vmem:[#allocation4] sm:$0xff]  ;;  %v51_v1 = vld [vmem:[#allocation4 + $0x8] sm:$0xff]  ;;  %s106_s22 = sshll.u32 %s228_s2, 4  ;;  %s201_s24 = smov [#allocation9]   ;;  %s107_s22 = int_to_ptr.hbm [resolvable:$true] %s106_s22 }
   0xd   :  { %v54_v2 = vmul.f32 0.5, %v50_v0  ;;  %v55_v3 = vmul.f32 0.5, %v51_v1  ;;  %v52_v7 = vld [vmem:[#allocation7] sm:$0xff]  ;;  %v53_v9 = vld [vmem:[#allocation7 + $0x8] sm:$0xff] }
   0xf   :  { %127 = vtanh.f32 %v54_v2 }
  0x10   :  { %129 = vtanh.f32 %v55_v3 }
  0x15   :  { %v128_v4 = vpop.eup %127 }
  0x16   :  { %v130_v5 = vpop.eup %129  ;;  %v58_v6 = vadd.f32 1.0, %v128_v4 }
  0x17   :  { %v59_v8 = vadd.f32 1.0, %v130_v5 }
  0x18   :  { %v60_v10 = vmul.f32 0.5, %v58_v6 }
  0x19   :  { %v61_v11 = vmul.f32 0.5, %v59_v8 }
  0x1a   :  { %v63_v12 = vmul.f32 %v60_v10, %v52_v7  ;;  %v69_v15 = vadd.f32 %v60_v10, %v52_v7 }
  0x1b   :  { %v64_v13 = vmul.f32 %v61_v11, %v53_v9  ;;  %v70_v16 = vadd.f32 %v61_v11, %v53_v9 }
  0x1d   :  { %v65_v14 = vadd.f32 %v64_v13, %v63_v12  ;;  %v71_v17 = vadd.f32 %v70_v16, %v69_v15 }
  0x1f   :  { %78 = vadd.xlane.f32.xlu0 %v65_v14 }
  0x27   :  { %90 = vadd.xlane.f32.xlu0 %v71_v17 }
  0x92   :  { %v79_v18 = vpop.xlane.xlu0 %78 }
  0x93   :  { %v80_v19 = vrot.slane %v79_v18, 4 }
  0x95   :  { %v81_v20 = vadd.f32 %v80_v19, %v79_v18 }
  0x97   :  { %v82_v21 = vrot.slane %v81_v20, 2 }
  0x99   :  { %v83_v22 = vadd.f32 %v82_v21, %v81_v20 }
  0x9a   :  { %v91_v23 = vpop.xlane.xlu0 %90 }
  0x9b   :  { %v92_v24 = vrot.slane %v91_v23, 4  ;;  %v84_v25 = vrot.slane %v83_v22, 1 }
  0x9d   :  { %v93_v26 = vadd.f32 %v92_v24, %v91_v23  ;;  %v85_v27 = vadd.f32 %v84_v25, %v83_v22 }
  0x9f   :  { %v94_v28 = vrot.slane %v93_v26, 2  ;;  %118 = vpush %v85_v27 }
  0xa1   :  { %v95_v29 = vadd.f32 %v94_v28, %v93_v26 }
  0xa3   :  { %v96_v30 = vrot.slane %v95_v29, 1 }
  0xa5   :  { %v97_v31 = vadd.f32 %v96_v30, %v95_v29 }
  0xa7   :  { %120 = vpush %v97_v31 }
  0xd0   :  { %s119_s0 = spop %118 }
  0xd1   :  { %88 = sst [smem:[#allocation9]] %s119_s0 }
  0xd8   :  { %s121_s23 = spop %120 }
  0xd9   :  { %100 = sst [smem:[#allocation9 + $0x1]] %s121_s23 }
  0xda   :  { %109 = dma.smem_to_hbm %s201_s24, 16, %s107_s22, [#allocation6]  }
  0xdb   :  { %195 = dma.done.wait [#allocation6], 16  }
  0xdc   :  { %196 = vsyncadd [#allocation6], 4294967280 }
  0xdd   :  { %114 = sfence }
  0xde   :  { %115 = vsyncpa [#allocation5], 1 }
  0xdf   :  { %116 = vsyncpa [#allocation8], 1 }
  0xe0   :  { %117 = vsyncpa [#allocation6], 1 }

</bundles_post_ra>
